<compile_context>
chip_gen: v6e
topology: v6e:2x2x1
jax: 0.10.0
libtpu: 0.0.40
codegen_flags: <defaults>
</compile_context>

<pallas_src>
import jax
import jax.numpy as jnp
import numpy as np
from jax.experimental import pallas as pl
from jax.experimental.pallas import tpu as pltpu


def _vspec():
    # full-array block resident in VMEM (no grid tiling; shapes are tiny)
    return pl.BlockSpec(memory_space=pltpu.MemorySpace.VMEM)


# ----------------------------------------------------------------------------
# Fused kernel: LSTM recurrence -> encoder Linear -> decoder MLP.
#
# Weight layout (all prepared at trace time in the wrapper):
#   wih_ref : (D, 4H)   input->gates,  gate columns ordered [i, f, o, g]
#   whh_ref : (H, 4H)   hidden->gates, same gate order
#   b_ref   : (1, 4H)   b_ih + b_hh, same gate order
#   wenc_ref: (H, E), benc_ref: (1, E)
#   wd1e_ref: (E, H)    encoded-half of decoder W1^T
#   bd1_ref : (1, H)    b_d1 + (constant context) @ W1^T[E:, :]   (folded)
#   wd2_ref : (H, D), bd2_ref: (1, D)
# ----------------------------------------------------------------------------
def fused_kernel(x_ref, wih_ref, whh_ref, b_ref,
                 wenc_ref, benc_ref,
                 wd1e_ref, bd1_ref, wd2_ref, bd2_ref,
                 encoded_ref, decoded_ref):
    T, B, D = x_ref.shape
    H = whh_ref.shape[0]
    H4 = whh_ref.shape[1]          # == 4H

    # ---- hoisted input projection: one matmul for all T steps ----
    x2 = x_ref[...].reshape(T * B, D)                                   # (T*B, D)
    inp = (jnp.dot(x2, wih_ref[...], preferred_element_type=jnp.float32)
           + b_ref[...])                                                # (T*B, 4H)
    inp = inp.reshape(T, B, H4)                                         # (T, B, 4H)

    whh = whh_ref[...]

    # ---- fully unrolled LSTM recurrence (T is small and static) ----
    h = jnp.zeros((B, H), jnp.float32)
    c = jnp.zeros((B, H), jnp.float32)
    for t in range(T):
        gates = inp[t] + jnp.dot(h, whh, preferred_element_type=jnp.float32)  # (B, 4H)
        sig = jax.nn.sigmoid(gates[:, :3 * H])      # [i | f | o] in one EUP issue
        g_g = jnp.tanh(gates[:, 3 * H:])            # g gate
        c = sig[:, H:2 * H] * c + sig[:, :H] * g_g
        h = sig[:, 2 * H:3 * H] * jnp.tanh(c)

    # ---- encoder linear:  encoded = h_last @ W_enc^T + b_enc ----
    encoded = (jnp.dot(h, wenc_ref[...], preferred_element_type=jnp.float32)
               + benc_ref[...])                                         # (B, E)
    encoded_ref[...] = encoded

    # ---- decoder MLP ----
    # TODO(synk): the source's attention context is provably the constant 1/seq_len
    # matrix (softmax over rows repeated from `hidden`), so its contribution is
    # pre-folded into bd1_ref; encoder_outputs never affect the outputs.
    pre = (jnp.dot(encoded, wd1e_ref[...], preferred_element_type=jnp.float32)
           + bd1_ref[...])
    hdec = jnp.maximum(pre, 0.0)
    decoded_ref[...] = (jnp.dot(hdec, wd2_ref[...], preferred_element_type=jnp.float32)
                        + bd2_ref[...])


# ----------------------------------------------------------------------------
# Wrapper: trace-time weight prep (gate reorder, transposes, context fold) +
# a single pallas_call.
# ----------------------------------------------------------------------------
def attention_autoencoder_forward(x, p):
    B, T, D = x.shape
    H = p["w_hh"].shape[1]
    E = p["w_enc"].shape[0]
    # Source attention requires seq_len == batch (dim-0 cat) and batch == hidden
    # (decoder input width).
    assert B == T and B == H, "source semantics require batch == seq_len == hidden_size"

    def reorder_gates(w, axis):
        # PyTorch gate order [i, f, g, o] -> [i, f, o, g] so sigmoid covers a
        # contiguous 3H block and tanh the trailing H block.
        i, f, g, o = jnp.split(w, 4, axis=axis)
        return jnp.concatenate([i, f, o, g], axis=axis)

    wih_r = reorder_gates(p["w_ih"], 0).T                     # (D, 4H)
    whh_r = reorder_gates(p["w_hh"], 0).T                     # (H, 4H)
    b_r = reorder_gates(p["b_ih"] + p["b_hh"], 0).reshape(1, 4 * H)

    x_tm = jnp.transpose(x, (1, 0, 2))                        # (T, B, D), 1 KiB, trace-time op

    wd1_t = p["w_d1"].T                                       # (E+H, H)
    wd1_e = wd1_t[:E, :]                                      # encoded half
    # context == full((B, B), 1/B) exactly  ->  context @ wd1_t[E:, :] is a
    # constant (1, H) row; fold it into the decoder bias (trace-time, free).
    bd1_eff = (p["b_d1"].reshape(1, H)
               + jnp.sum(wd1_t[E:, :], axis=0, keepdims=True) / B)

    encoded, decoded = pl.pallas_call(
        fused_kernel,
        out_shape=(jax.ShapeDtypeStruct((B, E), jnp.float32),
                   jax.ShapeDtypeStruct((B, D), jnp.float32)),
        in_specs=[_vspec()] * 10,
        out_specs=(_vspec(), _vspec()),
    )(x_tm, wih_r, whh_r, b_r,
      p["w_enc"].T, p["b_enc"].reshape(1, E),
      wd1_e, bd1_eff,
      p["w_d2"].T, p["b_d2"].reshape(1, D))
    return encoded, decoded


# ----------------------------------------------------------------------------
# Pure-JAX reference (FULL computation, incl. the attention block) so the
# constant-context elision in the kernel is verified numerically.
# ----------------------------------------------------------------------------
def reference_forward(x, p):
    B, T, D = x.shape
    H = p["w_hh"].shape[1]

    def step(carry, x_t):
        h, c = carry
        g = x_t @ p["w_ih"].T + h @ p["w_hh"].T + p["b_ih"] + p["b_hh"]
        i, f, gg, o = jnp.split(g, 4, axis=-1)
        i, f, gg, o = jax.nn.sigmoid(i), jax.nn.sigmoid(f), jnp.tanh(gg), jax.nn.sigmoid(o)
        c = f * c + i * gg
        h = o * jnp.tanh(c)
        return (h, c), h

    (h, _c), outs = jax.lax.scan(step,
                                 (jnp.zeros((B, H)), jnp.zeros((B, H))),
                                 jnp.transpose(x, (1, 0, 2)))
    encoder_outputs = jnp.transpose(outs, (1, 0, 2))
    encoded = h @ p["w_enc"].T + p["b_enc"]
    h_rep = jnp.broadcast_to(h[:, None, :], (B, B, H))
    to_attn = jnp.concatenate([h_rep, encoder_outputs], axis=0)
    energy = jnp.tanh(to_attn @ p["w_attn"].T + p["b_attn"])
    scores = energy @ p["v"]
    attn = jax.nn.softmax(scores, axis=1)
    context = attn[:B]
    dec_in = jnp.concatenate([encoded, context], axis=-1)
    hdec = jnp.maximum(dec_in @ p["w_d1"].T + p["b_d1"], 0.0)
    decoded = hdec @ p["w_d2"].T + p["b_d2"]
    return encoded, decoded


def init_params(key, input_dim, encoding_dim, hidden_size):
    H, E = hidden_size, encoding_dim
    ks = jax.random.split(key, 13)

    def unif(k, shape, fan_in):
        b = 1.0 / np.sqrt(fan_in)
        return jax.random.uniform(k, shape, jnp.float32, -b, b)

    return dict(
        w_ih=unif(ks[0], (4 * H, input_dim), H),
        w_hh=unif(ks[1], (4 * H, H), H),
        b_ih=unif(ks[2], (4 * H,), H),
        b_hh=unif(ks[3], (4 * H,), H),
        w_enc=unif(ks[4], (E, H), H),
        b_enc=unif(ks[5], (E,), H),
        w_attn=unif(ks[6], (H, H), H),
        b_attn=unif(ks[7], (H,), H),
        v=jax.random.uniform(ks[8], (H,), jnp.float32),      # torch.rand(H)
        w_d1=unif(ks[9], (H, E + H), E + H),
        b_d1=unif(ks[10], (H,), E + H),
        w_d2=unif(ks[11], (input_dim, H), H),
        b_d2=unif(ks[12], (input_dim,), H),
    )


if __name__ == "__main__":
    # The source attention requires seq_len == batch (its dim-0 cat) and
    # batch == hidden_size (decoder input width), so pick B = T = H.
    B = T = H = 8
    D_IN, ENC = 4, 16

    key = jax.random.PRNGKey(0)
    kx, kp = jax.random.split(key)
    x = jax.random.normal(kx, (B, T, D_IN), jnp.float32)
    params = init_params(kp, D_IN, ENC, H)

    fwd = jax.jit(attention_autoencoder_forward)
    encoded, decoded = jax.block_until_ready(fwd(x, params))
    ref_enc, ref_dec = reference_forward(x, params)

    np.testing.assert_allclose(np.asarray(encoded), np.asarray(ref_enc), rtol=2e-5, atol=2e-5)
    np.testing.assert_allclose(np.asarray(decoded), np.asarray(ref_dec), rtol=2e-5, atol=2e-5)
    assert encoded.shape == (B, ENC) and decoded.shape == (B, D_IN)
    print("KERNEL_OK")
</pallas_src>

<mosaic_0001>
module attributes {stable_mosaic.version = 11 : i64} {
  func.func @fused_kernel(%arg0: memref<8x8x4xf32, #tpu.memory_space<vmem>>, %arg1: memref<4x32xf32, #tpu.memory_space<vmem>>, %arg2: memref<8x32xf32, #tpu.memory_space<vmem>>, %arg3: memref<1x32xf32, #tpu.memory_space<vmem>>, %arg4: memref<8x16xf32, #tpu.memory_space<vmem>>, %arg5: memref<1x16xf32, #tpu.memory_space<vmem>>, %arg6: memref<16x8xf32, #tpu.memory_space<vmem>>, %arg7: memref<1x8xf32, #tpu.memory_space<vmem>>, %arg8: memref<8x4xf32, #tpu.memory_space<vmem>>, %arg9: memref<1x4xf32, #tpu.memory_space<vmem>>, %arg10: memref<8x16xf32, #tpu.memory_space<vmem>>, %arg11: memref<8x4xf32, #tpu.memory_space<vmem>>) attributes {dimension_semantics = [], scalar_prefetch = 0 : i64, scratch_operands = 0 : i64, tpu.core_type = #tpu.core_type<tc>} {
    %c0 = arith.constant 0 : index
    %c0_0 = arith.constant 0 : index
    %c0_1 = arith.constant 0 : index
    %0 = vector.load %arg0[%c0, %c0_0, %c0_1] : memref<8x8x4xf32, #tpu.memory_space<vmem>>, vector<8x8x4xf32>
    %1 = vector.shape_cast %0 : vector<8x8x4xf32> to vector<64x4xf32>
    %c0_2 = arith.constant 0 : index
    %c0_3 = arith.constant 0 : index
    %2 = vector.load %arg1[%c0_2, %c0_3] : memref<4x32xf32, #tpu.memory_space<vmem>>, vector<4x32xf32>
    %cst = arith.constant dense<0.000000e+00> : vector<64x32xf32>
    %3 = tpu.matmul %1, %2, %cst {dimension_numbers = #tpu.dot_dimension_numbers<[1], [0], [0], [1], [0, 0, 1, 1], [], []>} : vector<64x4xf32>, vector<4x32xf32>, vector<64x32xf32> -> vector<64x32xf32>
    %c0_4 = arith.constant 0 : index
    %c0_5 = arith.constant 0 : index
    %4 = vector.load %arg3[%c0_4, %c0_5] : memref<1x32xf32, #tpu.memory_space<vmem>>, vector<1x32xf32>
    %5 = vector.broadcast %4 : vector<1x32xf32> to vector<64x32xf32>
    %6 = arith.addf %3, %5 : vector<64x32xf32>
    %7 = vector.shape_cast %6 : vector<64x32xf32> to vector<8x8x32xf32>
    %c0_6 = arith.constant 0 : index
    %c0_7 = arith.constant 0 : index
    %8 = vector.load %arg2[%c0_6, %c0_7] : memref<8x32xf32, #tpu.memory_space<vmem>>, vector<8x32xf32>
    %cst_8 = arith.constant 0.000000e+00 : f32
    %9 = vector.broadcast %cst_8 : f32 to vector<8x8xf32>
    %cst_9 = arith.constant 0.000000e+00 : f32
    %10 = vector.broadcast %cst_9 : f32 to vector<8x8xf32>
    %11 = vector.extract_strided_slice %7 {offsets = [0, 0, 0], sizes = [1, 8, 32], strides = [1, 1, 1]} : vector<8x8x32xf32> to vector<1x8x32xf32>
    %12 = vector.shape_cast %11 : vector<1x8x32xf32> to vector<8x32xf32>
    %cst_10 = arith.constant dense<0.000000e+00> : vector<8x32xf32>
    %13 = tpu.matmul %9, %8, %cst_10 {dimension_numbers = #tpu.dot_dimension_numbers<[1], [0], [0], [1], [0, 0, 1, 1], [], []>} : vector<8x8xf32>, vector<8x32xf32>, vector<8x32xf32> -> vector<8x32xf32>
    %14 = arith.addf %12, %13 : vector<8x32xf32>
    %15 = vector.extract_strided_slice %14 {offsets = [0, 0], sizes = [8, 24], strides = [1, 1]} : vector<8x32xf32> to vector<8x24xf32>
    %16 = arith.negf %15 : vector<8x24xf32>
    %17 = math.exp %16 : vector<8x24xf32>
    %cst_11 = arith.constant 1.000000e+00 : f32
    %18 = vector.broadcast %cst_11 : f32 to vector<8x24xf32>
    %19 = arith.addf %18, %17 : vector<8x24xf32>
    %20 = arith.divf %18, %19 : vector<8x24xf32>
    %21 = vector.extract_strided_slice %14 {offsets = [0, 24], sizes = [8, 8], strides = [1, 1]} : vector<8x32xf32> to vector<8x8xf32>
    %22 = math.tanh %21 : vector<8x8xf32>
    %23 = vector.extract_strided_slice %20 {offsets = [0, 8], sizes = [8, 8], strides = [1, 1]} : vector<8x24xf32> to vector<8x8xf32>
    %24 = arith.mulf %23, %10 : vector<8x8xf32>
    %25 = vector.extract_strided_slice %20 {offsets = [0, 0], sizes = [8, 8], strides = [1, 1]} : vector<8x24xf32> to vector<8x8xf32>
    %26 = arith.mulf %25, %22 : vector<8x8xf32>
    %27 = arith.addf %24, %26 : vector<8x8xf32>
    %28 = vector.extract_strided_slice %20 {offsets = [0, 16], sizes = [8, 8], strides = [1, 1]} : vector<8x24xf32> to vector<8x8xf32>
    %29 = math.tanh %27 : vector<8x8xf32>
    %30 = arith.mulf %28, %29 : vector<8x8xf32>
    %31 = vector.extract_strided_slice %7 {offsets = [1, 0, 0], sizes = [1, 8, 32], strides = [1, 1, 1]} : vector<8x8x32xf32> to vector<1x8x32xf32>
    %32 = vector.shape_cast %31 : vector<1x8x32xf32> to vector<8x32xf32>
    %cst_12 = arith.constant dense<0.000000e+00> : vector<8x32xf32>
    %33 = tpu.matmul %30, %8, %cst_12 {dimension_numbers = #tpu.dot_dimension_numbers<[1], [0], [0], [1], [0, 0, 1, 1], [], []>} : vector<8x8xf32>, vector<8x32xf32>, vector<8x32xf32> -> vector<8x32xf32>
    %34 = arith.addf %32, %33 : vector<8x32xf32>
    %35 = vector.extract_strided_slice %34 {offsets = [0, 0], sizes = [8, 24], strides = [1, 1]} : vector<8x32xf32> to vector<8x24xf32>
    %36 = arith.negf %35 : vector<8x24xf32>
    %37 = math.exp %36 : vector<8x24xf32>
    %cst_13 = arith.constant 1.000000e+00 : f32
    %38 = vector.broadcast %cst_13 : f32 to vector<8x24xf32>
    %39 = arith.addf %38, %37 : vector<8x24xf32>
    %40 = arith.divf %38, %39 : vector<8x24xf32>
    %41 = vector.extract_strided_slice %34 {offsets = [0, 24], sizes = [8, 8], strides = [1, 1]} : vector<8x32xf32> to vector<8x8xf32>
    %42 = math.tanh %41 : vector<8x8xf32>
    %43 = vector.extract_strided_slice %40 {offsets = [0, 8], sizes = [8, 8], strides = [1, 1]} : vector<8x24xf32> to vector<8x8xf32>
    %44 = arith.mulf %43, %27 : vector<8x8xf32>
    %45 = vector.extract_strided_slice %40 {offsets = [0, 0], sizes = [8, 8], strides = [1, 1]} : vector<8x24xf32> to vector<8x8xf32>
    %46 = arith.mulf %45, %42 : vector<8x8xf32>
    %47 = arith.addf %44, %46 : vector<8x8xf32>
    %48 = vector.extract_strided_slice %40 {offsets = [0, 16], sizes = [8, 8], strides = [1, 1]} : vector<8x24xf32> to vector<8x8xf32>
    %49 = math.tanh %47 : vector<8x8xf32>
    %50 = arith.mulf %48, %49 : vector<8x8xf32>
    %51 = vector.extract_strided_slice %7 {offsets = [2, 0, 0], sizes = [1, 8, 32], strides = [1, 1, 1]} : vector<8x8x32xf32> to vector<1x8x32xf32>
    %52 = vector.shape_cast %51 : vector<1x8x32xf32> to vector<8x32xf32>
    %cst_14 = arith.constant dense<0.000000e+00> : vector<8x32xf32>
    %53 = tpu.matmul %50, %8, %cst_14 {dimension_numbers = #tpu.dot_dimension_numbers<[1], [0], [0], [1], [0, 0, 1, 1], [], []>} : vector<8x8xf32>, vector<8x32xf32>, vector<8x32xf32> -> vector<8x32xf32>
    %54 = arith.addf %52, %53 : vector<8x32xf32>
    %55 = vector.extract_strided_slice %54 {offsets = [0, 0], sizes = [8, 24], strides = [1, 1]} : vector<8x32xf32> to vector<8x24xf32>
    %56 = arith.negf %55 : vector<8x24xf32>
    %57 = math.exp %56 : vector<8x24xf32>
    %cst_15 = arith.constant 1.000000e+00 : f32
    %58 = vector.broadcast %cst_15 : f32 to vector<8x24xf32>
    %59 = arith.addf %58, %57 : vector<8x24xf32>
    %60 = arith.divf %58, %59 : vector<8x24xf32>
    %61 = vector.extract_strided_slice %54 {offsets = [0, 24], sizes = [8, 8], strides = [1, 1]} : vector<8x32xf32> to vector<8x8xf32>
    %62 = math.tanh %61 : vector<8x8xf32>
    %63 = vector.extract_strided_slice %60 {offsets = [0, 8], sizes = [8, 8], strides = [1, 1]} : vector<8x24xf32> to vector<8x8xf32>
    %64 = arith.mulf %63, %47 : vector<8x8xf32>
    %65 = vector.extract_strided_slice %60 {offsets = [0, 0], sizes = [8, 8], strides = [1, 1]} : vector<8x24xf32> to vector<8x8xf32>
    %66 = arith.mulf %65, %62 : vector<8x8xf32>
    %67 = arith.addf %64, %66 : vector<8x8xf32>
    %68 = vector.extract_strided_slice %60 {offsets = [0, 16], sizes = [8, 8], strides = [1, 1]} : vector<8x24xf32> to vector<8x8xf32>
    %69 = math.tanh %67 : vector<8x8xf32>
    %70 = arith.mulf %68, %69 : vector<8x8xf32>
    %71 = vector.extract_strided_slice %7 {offsets = [3, 0, 0], sizes = [1, 8, 32], strides = [1, 1, 1]} : vector<8x8x32xf32> to vector<1x8x32xf32>
    %72 = vector.shape_cast %71 : vector<1x8x32xf32> to vector<8x32xf32>
    %cst_16 = arith.constant dense<0.000000e+00> : vector<8x32xf32>
    %73 = tpu.matmul %70, %8, %cst_16 {dimension_numbers = #tpu.dot_dimension_numbers<[1], [0], [0], [1], [0, 0, 1, 1], [], []>} : vector<8x8xf32>, vector<8x32xf32>, vector<8x32xf32> -> vector<8x32xf32>
    %74 = arith.addf %72, %73 : vector<8x32xf32>
    %75 = vector.extract_strided_slice %74 {offsets = [0, 0], sizes = [8, 24], strides = [1, 1]} : vector<8x32xf32> to vector<8x24xf32>
    %76 = arith.negf %75 : vector<8x24xf32>
    %77 = math.exp %76 : vector<8x24xf32>
    %cst_17 = arith.constant 1.000000e+00 : f32
    %78 = vector.broadcast %cst_17 : f32 to vector<8x24xf32>
    %79 = arith.addf %78, %77 : vector<8x24xf32>
    %80 = arith.divf %78, %79 : vector<8x24xf32>
    %81 = vector.extract_strided_slice %74 {offsets = [0, 24], sizes = [8, 8], strides = [1, 1]} : vector<8x32xf32> to vector<8x8xf32>
    %82 = math.tanh %81 : vector<8x8xf32>
    %83 = vector.extract_strided_slice %80 {offsets = [0, 8], sizes = [8, 8], strides = [1, 1]} : vector<8x24xf32> to vector<8x8xf32>
    %84 = arith.mulf %83, %67 : vector<8x8xf32>
    %85 = vector.extract_strided_slice %80 {offsets = [0, 0], sizes = [8, 8], strides = [1, 1]} : vector<8x24xf32> to vector<8x8xf32>
    %86 = arith.mulf %85, %82 : vector<8x8xf32>
    %87 = arith.addf %84, %86 : vector<8x8xf32>
    %88 = vector.extract_strided_slice %80 {offsets = [0, 16], sizes = [8, 8], strides = [1, 1]} : vector<8x24xf32> to vector<8x8xf32>
    %89 = math.tanh %87 : vector<8x8xf32>
    %90 = arith.mulf %88, %89 : vector<8x8xf32>
    %91 = vector.extract_strided_slice %7 {offsets = [4, 0, 0], sizes = [1, 8, 32], strides = [1, 1, 1]} : vector<8x8x32xf32> to vector<1x8x32xf32>
    %92 = vector.shape_cast %91 : vector<1x8x32xf32> to vector<8x32xf32>
    %cst_18 = arith.constant dense<0.000000e+00> : vector<8x32xf32>
    %93 = tpu.matmul %90, %8, %cst_18 {dimension_numbers = #tpu.dot_dimension_numbers<[1], [0], [0], [1], [0, 0, 1, 1], [], []>} : vector<8x8xf32>, vector<8x32xf32>, vector<8x32xf32> -> vector<8x32xf32>
    %94 = arith.addf %92, %93 : vector<8x32xf32>
    %95 = vector.extract_strided_slice %94 {offsets = [0, 0], sizes = [8, 24], strides = [1, 1]} : vector<8x32xf32> to vector<8x24xf32>
    %96 = arith.negf %95 : vector<8x24xf32>
    %97 = math.exp %96 : vector<8x24xf32>
    %cst_19 = arith.constant 1.000000e+00 : f32
    %98 = vector.broadcast %cst_19 : f32 to vector<8x24xf32>
    %99 = arith.addf %98, %97 : vector<8x24xf32>
    %100 = arith.divf %98, %99 : vector<8x24xf32>
    %101 = vector.extract_strided_slice %94 {offsets = [0, 24], sizes = [8, 8], strides = [1, 1]} : vector<8x32xf32> to vector<8x8xf32>
    %102 = math.tanh %101 : vector<8x8xf32>
    %103 = vector.extract_strided_slice %100 {offsets = [0, 8], sizes = [8, 8], strides = [1, 1]} : vector<8x24xf32> to vector<8x8xf32>
    %104 = arith.mulf %103, %87 : vector<8x8xf32>
    %105 = vector.extract_strided_slice %100 {offsets = [0, 0], sizes = [8, 8], strides = [1, 1]} : vector<8x24xf32> to vector<8x8xf32>
    %106 = arith.mulf %105, %102 : vector<8x8xf32>
    %107 = arith.addf %104, %106 : vector<8x8xf32>
    %108 = vector.extract_strided_slice %100 {offsets = [0, 16], sizes = [8, 8], strides = [1, 1]} : vector<8x24xf32> to vector<8x8xf32>
    %109 = math.tanh %107 : vector<8x8xf32>
    %110 = arith.mulf %108, %109 : vector<8x8xf32>
    %111 = vector.extract_strided_slice %7 {offsets = [5, 0, 0], sizes = [1, 8, 32], strides = [1, 1, 1]} : vector<8x8x32xf32> to vector<1x8x32xf32>
    %112 = vector.shape_cast %111 : vector<1x8x32xf32> to vector<8x32xf32>
    %cst_20 = arith.constant dense<0.000000e+00> : vector<8x32xf32>
    %113 = tpu.matmul %110, %8, %cst_20 {dimension_numbers = #tpu.dot_dimension_numbers<[1], [0], [0], [1], [0, 0, 1, 1], [], []>} : vector<8x8xf32>, vector<8x32xf32>, vector<8x32xf32> -> vector<8x32xf32>
    %114 = arith.addf %112, %113 : vector<8x32xf32>
    %115 = vector.extract_strided_slice %114 {offsets = [0, 0], sizes = [8, 24], strides = [1, 1]} : vector<8x32xf32> to vector<8x24xf32>
    %116 = arith.negf %115 : vector<8x24xf32>
    %117 = math.exp %116 : vector<8x24xf32>
    %cst_21 = arith.constant 1.000000e+00 : f32
    %118 = vector.broadcast %cst_21 : f32 to vector<8x24xf32>
    %119 = arith.addf %118, %117 : vector<8x24xf32>
    %120 = arith.divf %118, %119 : vector<8x24xf32>
    %121 = vector.extract_strided_slice %114 {offsets = [0, 24], sizes = [8, 8], strides = [1, 1]} : vector<8x32xf32> to vector<8x8xf32>
    %122 = math.tanh %121 : vector<8x8xf32>
    %123 = vector.extract_strided_slice %120 {offsets = [0, 8], sizes = [8, 8], strides = [1, 1]} : vector<8x24xf32> to vector<8x8xf32>
    %124 = arith.mulf %123, %107 : vector<8x8xf32>
    %125 = vector.extract_strided_slice %120 {offsets = [0, 0], sizes = [8, 8], strides = [1, 1]} : vector<8x24xf32> to vector<8x8xf32>
    %126 = arith.mulf %125, %122 : vector<8x8xf32>
    %127 = arith.addf %124, %126 : vector<8x8xf32>
    %128 = vector.extract_strided_slice %120 {offsets = [0, 16], sizes = [8, 8], strides = [1, 1]} : vector<8x24xf32> to vector<8x8xf32>
    %129 = math.tanh %127 : vector<8x8xf32>
    %130 = arith.mulf %128, %129 : vector<8x8xf32>
    %131 = vector.extract_strided_slice %7 {offsets = [6, 0, 0], sizes = [1, 8, 32], strides = [1, 1, 1]} : vector<8x8x32xf32> to vector<1x8x32xf32>
    %132 = vector.shape_cast %131 : vector<1x8x32xf32> to vector<8x32xf32>
    %cst_22 = arith.constant dense<0.000000e+00> : vector<8x32xf32>
    %133 = tpu.matmul %130, %8, %cst_22 {dimension_numbers = #tpu.dot_dimension_numbers<[1], [0], [0], [1], [0, 0, 1, 1], [], []>} : vector<8x8xf32>, vector<8x32xf32>, vector<8x32xf32> -> vector<8x32xf32>
    %134 = arith.addf %132, %133 : vector<8x32xf32>
    %135 = vector.extract_strided_slice %134 {offsets = [0, 0], sizes = [8, 24], strides = [1, 1]} : vector<8x32xf32> to vector<8x24xf32>
    %136 = arith.negf %135 : vector<8x24xf32>
    %137 = math.exp %136 : vector<8x24xf32>
    %cst_23 = arith.constant 1.000000e+00 : f32
    %138 = vector.broadcast %cst_23 : f32 to vector<8x24xf32>
    %139 = arith.addf %138, %137 : vector<8x24xf32>
    %140 = arith.divf %138, %139 : vector<8x24xf32>
    %141 = vector.extract_strided_slice %134 {offsets = [0, 24], sizes = [8, 8], strides = [1, 1]} : vector<8x32xf32> to vector<8x8xf32>
    %142 = math.tanh %141 : vector<8x8xf32>
    %143 = vector.extract_strided_slice %140 {offsets = [0, 8], sizes = [8, 8], strides = [1, 1]} : vector<8x24xf32> to vector<8x8xf32>
    %144 = arith.mulf %143, %127 : vector<8x8xf32>
    %145 = vector.extract_strided_slice %140 {offsets = [0, 0], sizes = [8, 8], strides = [1, 1]} : vector<8x24xf32> to vector<8x8xf32>
    %146 = arith.mulf %145, %142 : vector<8x8xf32>
    %147 = arith.addf %144, %146 : vector<8x8xf32>
    %148 = vector.extract_strided_slice %140 {offsets = [0, 16], sizes = [8, 8], strides = [1, 1]} : vector<8x24xf32> to vector<8x8xf32>
    %149 = math.tanh %147 : vector<8x8xf32>
    %150 = arith.mulf %148, %149 : vector<8x8xf32>
    %151 = vector.extract_strided_slice %7 {offsets = [7, 0, 0], sizes = [1, 8, 32], strides = [1, 1, 1]} : vector<8x8x32xf32> to vector<1x8x32xf32>
    %152 = vector.shape_cast %151 : vector<1x8x32xf32> to vector<8x32xf32>
    %cst_24 = arith.constant dense<0.000000e+00> : vector<8x32xf32>
    %153 = tpu.matmul %150, %8, %cst_24 {dimension_numbers = #tpu.dot_dimension_numbers<[1], [0], [0], [1], [0, 0, 1, 1], [], []>} : vector<8x8xf32>, vector<8x32xf32>, vector<8x32xf32> -> vector<8x32xf32>
    %154 = arith.addf %152, %153 : vector<8x32xf32>
    %155 = vector.extract_strided_slice %154 {offsets = [0, 0], sizes = [8, 24], strides = [1, 1]} : vector<8x32xf32> to vector<8x24xf32>
    %156 = arith.negf %155 : vector<8x24xf32>
    %157 = math.exp %156 : vector<8x24xf32>
    %cst_25 = arith.constant 1.000000e+00 : f32
    %158 = vector.broadcast %cst_25 : f32 to vector<8x24xf32>
    %159 = arith.addf %158, %157 : vector<8x24xf32>
    %160 = arith.divf %158, %159 : vector<8x24xf32>
    %161 = vector.extract_strided_slice %154 {offsets = [0, 24], sizes = [8, 8], strides = [1, 1]} : vector<8x32xf32> to vector<8x8xf32>
    %162 = math.tanh %161 : vector<8x8xf32>
    %163 = vector.extract_strided_slice %160 {offsets = [0, 8], sizes = [8, 8], strides = [1, 1]} : vector<8x24xf32> to vector<8x8xf32>
    %164 = arith.mulf %163, %147 : vector<8x8xf32>
    %165 = vector.extract_strided_slice %160 {offsets = [0, 0], sizes = [8, 8], strides = [1, 1]} : vector<8x24xf32> to vector<8x8xf32>
    %166 = arith.mulf %165, %162 : vector<8x8xf32>
    %167 = arith.addf %164, %166 : vector<8x8xf32>
    %168 = vector.extract_strided_slice %160 {offsets = [0, 16], sizes = [8, 8], strides = [1, 1]} : vector<8x24xf32> to vector<8x8xf32>
    %169 = math.tanh %167 : vector<8x8xf32>
    %170 = arith.mulf %168, %169 : vector<8x8xf32>
    %c0_26 = arith.constant 0 : index
    %c0_27 = arith.constant 0 : index
    %171 = vector.load %arg4[%c0_26, %c0_27] : memref<8x16xf32, #tpu.memory_space<vmem>>, vector<8x16xf32>
    %cst_28 = arith.constant dense<0.000000e+00> : vector<8x16xf32>
    %172 = tpu.matmul %170, %171, %cst_28 {dimension_numbers = #tpu.dot_dimension_numbers<[1], [0], [0], [1], [0, 0, 1, 1], [], []>} : vector<8x8xf32>, vector<8x16xf32>, vector<8x16xf32> -> vector<8x16xf32>
    %c0_29 = arith.constant 0 : index
    %c0_30 = arith.constant 0 : index
    %173 = vector.load %arg5[%c0_29, %c0_30] : memref<1x16xf32, #tpu.memory_space<vmem>>, vector<1x16xf32>
    %174 = vector.broadcast %173 : vector<1x16xf32> to vector<8x16xf32>
    %175 = arith.addf %172, %174 : vector<8x16xf32>
    %c0_31 = arith.constant 0 : index
    %c0_32 = arith.constant 0 : index
    %176 = vector.load %arg10[%c0_31, %c0_32] : memref<8x16xf32, #tpu.memory_space<vmem>>, vector<8x16xf32>
    tpu.vector_store %arg10[%c0_31, %c0_32], %175 {strides = array<i32>} : memref<8x16xf32, #tpu.memory_space<vmem>>, vector<8x16xf32>,
    %c0_33 = arith.constant 0 : index
    %c0_34 = arith.constant 0 : index
    %177 = vector.load %arg6[%c0_33, %c0_34] : memref<16x8xf32, #tpu.memory_space<vmem>>, vector<16x8xf32>
    %cst_35 = arith.constant dense<0.000000e+00> : vector<8x8xf32>
    %178 = tpu.matmul %175, %177, %cst_35 {dimension_numbers = #tpu.dot_dimension_numbers<[1], [0], [0], [1], [0, 0, 1, 1], [], []>} : vector<8x16xf32>, vector<16x8xf32>, vector<8x8xf32> -> vector<8x8xf32>
    %c0_36 = arith.constant 0 : index
    %c0_37 = arith.constant 0 : index
    %179 = vector.load %arg7[%c0_36, %c0_37] : memref<1x8xf32, #tpu.memory_space<vmem>>, vector<1x8xf32>
    %180 = vector.broadcast %179 : vector<1x8xf32> to vector<8x8xf32>
    %181 = arith.addf %178, %180 : vector<8x8xf32>
    %cst_38 = arith.constant 0.000000e+00 : f32
    %182 = vector.broadcast %cst_38 : f32 to vector<8x8xf32>
    %183 = arith.maximumf %181, %182 : vector<8x8xf32>
    %c0_39 = arith.constant 0 : index
    %c0_40 = arith.constant 0 : index
    %184 = vector.load %arg8[%c0_39, %c0_40] : memref<8x4xf32, #tpu.memory_space<vmem>>, vector<8x4xf32>
    %cst_41 = arith.constant dense<0.000000e+00> : vector<8x4xf32>
    %185 = tpu.matmul %183, %184, %cst_41 {dimension_numbers = #tpu.dot_dimension_numbers<[1], [0], [0], [1], [0, 0, 1, 1], [], []>} : vector<8x8xf32>, vector<8x4xf32>, vector<8x4xf32> -> vector<8x4xf32>
    %c0_42 = arith.constant 0 : index
    %c0_43 = arith.constant 0 : index
    %186 = vector.load %arg9[%c0_42, %c0_43] : memref<1x4xf32, #tpu.memory_space<vmem>>, vector<1x4xf32>
    %187 = vector.broadcast %186 : vector<1x4xf32> to vector<8x4xf32>
    %188 = arith.addf %185, %187 : vector<8x4xf32>
    %c0_44 = arith.constant 0 : index
    %c0_45 = arith.constant 0 : index
    %189 = vector.load %arg11[%c0_44, %c0_45] : memref<8x4xf32, #tpu.memory_space<vmem>>, vector<8x4xf32>
    tpu.vector_store %arg11[%c0_44, %c0_45], %188 {strides = array<i32>} : memref<8x4xf32, #tpu.memory_space<vmem>>, vector<8x4xf32>,
    return
  }
}

</mosaic_0001>

<bundles_post_ra>
// kernel: attention_autoencoder_forward.1
= control target key start
LH: loop header
LB: loop body
LE: loop exit
PB: predicated region body
PF: predicated region fallthrough
CT: control target
= control target key end

     0   :  { %vm79_vm0 = vcmask 1043456   ;;  %vm54_vm1 = vcmask 31744   ;;  %s1716_s0 = inlined_call_operand.vmem [shape: f32[8,8,4], index: 0, kind: input, shape index: {}]   ;;  %s1717_s1 = inlined_call_operand.vmem [shape: f32[4,32], index: 1, kind: input, shape index: {}]   ;;  %s1718_s2 = inlined_call_operand.vmem [shape: f32[8,32], index: 2, kind: input, shape index: {}]   ;;  %s1719_s3 = inlined_call_operand.vmem [shape: f32[1,32], index: 3, kind: input, shape index: {}]   ;;  %s1720_s4 = inlined_call_operand.vmem [shape: f32[8,16], index: 4, kind: input, shape index: {}]   ;;  %s1721_s5 = inlined_call_operand.vmem [shape: f32[1,16], index: 5, kind: input, shape index: {}]   ;;  %s1722_s6 = inlined_call_operand.vmem [shape: f32[16,8], index: 6, kind: input, shape index: {}]   ;;  %s1723_s7 = inlined_call_operand.vmem [shape: f32[1,8], index: 7, kind: input, shape index: {}]   ;;  %s1724_s8 = inlined_call_operand.vmem [shape: f32[8,4], index: 8, kind: input, shape index: {}]   ;;  %s1725_s9 = inlined_call_operand.vmem [shape: f32[1,4], index: 9, kind: input, shape index: {}]   ;;  %s1726_s10 = inlined_call_operand.hbm [shape: f32[8,16], index: 10, kind: output, shape index: {0}]   ;;  %s1727_s11 = inlined_call_operand.vmem [shape: f32[8,4], index: 11, kind: output, shape index: {1}]  }
   0x1   :  { %v46_v0 = vld [vmem:[%s1717_s1] sm:$0xf]  ;;  %v39_v2 = vld [vmem:[%s1716_s0 + $0x8] sm:$0xff] }
   0x2   :  { %v38_v1 = vld [vmem:[%s1716_s0] sm:$0xff]  ;;  %1319 = vmatprep.subr.msk.mxu0 %vm79_vm0, %v46_v0 }
   0x3   :  { %1321 = vmatprep.mubr.msk.f32.mxu0 %vm54_vm1, %v38_v1  ;;  %v1561_v3 = vld [vmem:[%s1718_s2] sm:$0xff] }
   0x4   :  { %17 = vsyncpa [#allocation3], 0  ;;  %1320 = vmatpush3.msk.msra.mxu0 %vm79_vm0, %v46_v0  ;;  %v1482_v4 = vmov 0.0   ;;  %vm1483_vm2 = vmmov 0   ;;  %v1580_v6 = vld [vmem:[%s1719_s3] ss:$0 sm:$0xff] }
   0x5   :  { %1333 = vmatprep.subr.mxu1 %v1482_v4  ;;  %1322 = vmatmul.mubr.msk.f32.vlgmr.msra.gmra.mxu0 %vm54_vm1, %v39_v2  ;;  %s1484_s25 = smov 104   ;;  %s1485_s3 = smov 8   ;;  %vm189_vm3 = vcmask 64512   ;;  %v40_v40 = vld [vmem:[%s1716_s0 + $0x10] sm:$0xff]  ;;  %v41_v41 = vld [vmem:[%s1716_s0 + $0x18] sm:$0xff]  ;;  %vm1071_vm4 = vcmask 130048  }
   0x6   :  { %1334 = vmatpush3.msra.mxu1 %v1561_v3  ;;  %1335 = vmatprep.mubr.msk.f32.mxu1 %vm1483_vm2, %v1482_v4  ;;  %s1486_s26 = smov 112  }
   0x7   :  { %1338 = vmatprep.subr.mxu1 %v1482_v4  ;;  %1336 = vmatmul.mubr.f32.vlgmr.msra.gmra.mxu1 %v1482_v4 }
   0x8   :  { %1353 = vmatprep.subr.mxu0 %v1482_v4  ;;  %1339 = vmatpush3.msra.mxu1 %v1561_v3 }
   0x9   :  { %1340 = vmatprep.mubr.msk.f32.mxu1 %vm1483_vm2, %v1482_v4  ;;  %1343 = vmatprep.subr.mxu1 %v1482_v4 }
   0xa   :  { %1354 = vmatpush3.msra.mxu0 %v1561_v3  ;;  %1324 = vmatprep.mubr.msk.f32.mxu0 %vm54_vm1, %v40_v40 }
   0xb   :  { %1363 = vmatprep.subr.mxu0 %v1482_v4  ;;  %1325 = vmatmul.mubr.msk.f32.gmra.mxu0 %vm54_vm1, %v41_v41 }
  0xc5   :  { %v1323_v5 = vpop.f32.mrf.mxu0 }
  0xc6   :  { %v155_v26 = vadd.f32 %v1323_v5, %v1580_v6 }
  0xc7   :  { %v149_v7 = vpop.f32.mrf.mxu0  ;;  %v259_v8 = vpop.f32.mrf.mxu1 }
  0xc8   :  { %v150_v9 = vadd.f32 %v1580_v6, %v149_v7 }
  0xc9   :  { %v1337_v10 = vpop.f32.mrf.mxu1 }
  0xca   :  { %v263_v11 = vadd.f32 %v259_v8, %v150_v9 }
  0xcb   :  { %v1326_v46 = vpop.f32.mrf.mxu0 }
  0xcc   :  { %1396 = vtanh.f32 %v263_v11  ;;  %v1266_v13 = vmul.f32 -1.442695, %v263_v11  ;;  %v165_v2 = vadd.f32 %v1326_v46, %v1580_v6 }
  0xcd   :  { %v159_v47 = vpop.f32.mrf.mxu0 }
  0xce   :  { %1398 = vpow2.f32 %v1266_v13  ;;  %v160_v48 = vadd.f32 %v1580_v6, %v159_v47 }
  0xd9   :  { %v1397_v12 = vpop.eup %1396 }
  0xda   :  { %273 = vrot.lane.b32.xlu0 %v1397_v12, %s1484_s25 }
  0xdb   :  { %v1399_v14 = vpop.eup %1398 }
  0xdc   :  { %v267_v15 = vadd.f32 1.0, %v1399_v14 }
  0xde   :  { %1400 = vrcp.f32 %v267_v15 }
  0xeb   :  { %v1401_v16 = vpop.eup %1400 }
  0xec   :  { %v271_v19 = vmul.f32 0.0, %v1401_v16 }
 0x14c   :  { %v274_v17 = vpop.permute.xlu0 %273 }
 0x14d   :  { %v276_v18 = vmul.f32 %v1401_v16, %v274_v17 }
 0x14f   :  { %278 = vrot.lane.b32.xlu0 %v276_v18, %s1485_s3 }
 0x1c1   :  { %v279_v20 = vpop.permute.xlu0 %278 }
 0x1c2   :  { %v281_v21 = vadd.f32 %v279_v20, %v271_v19  ;;  %v42_v19 = vld [vmem:[%s1716_s0 + $0x20] sm:$0xff]  ;;  %v43_v20 = vld [vmem:[%s1716_s0 + $0x28] sm:$0xff] }
 0x1c3   :  { %1327 = vmatprep.mubr.msk.f32.mxu0 %vm54_vm1, %v42_v19 }
 0x1c4   :  { %1402 = vtanh.f32 %v281_v21  ;;  %1328 = vmatmul.mubr.msk.f32.gmra.mxu0 %vm54_vm1, %v43_v20 }
 0x1d1   :  { %v1403_v22 = vpop.eup %1402 }
 0x1d2   :  { %284 = vrot.lane.b32.xlu1 %v1403_v22, %s1485_s3  ;;  %v45_v22 = vld [vmem:[%s1716_s0 + $0x38] sm:$0xff] }
 0x244   :  { %v285_v23 = vpop.permute.xlu1 %284 }
 0x245   :  { %v287_v24 = vmul.f32 %v1401_v16, %v285_v23 }
 0x247   :  { %289 = vrot.lane.b32.xlu1 %v287_v24, %s1486_s26 }
 0x2b9   :  { %v290_v25 = vpop.permute.xlu1 %289 }
 0x2ba   :  { %1341 = vmatmul.mubr.msk.f32.vlgmr.msra.gmra.mxu1 %vm189_vm3, %v290_v25 }
 0x2bb   :  { %1344 = vmatpush3.msra.mxu1 %v1561_v3  ;;  %1345 = vmatprep.mubr.msk.f32.mxu1 %vm1483_vm2, %v1482_v4 }
 0x2bc   :  { %1348 = vmatprep.subr.mxu1 %v1482_v4 }
 0x37a   :  { %v359_v27 = vpop.f32.mrf.mxu1 }
 0x37b   :  { %v363_v28 = vadd.f32 %v359_v27, %v155_v26  ;;  %v1329_v27 = vpop.f32.mrf.mxu0 }
 0x37c   :  { %v1342_v29 = vpop.f32.mrf.mxu1 }
 0x37d   :  { %1404 = vtanh.f32 %v363_v28  ;;  %v1268_v31 = vmul.f32 -1.442695, %v363_v28  ;;  %v169_v28 = vpop.f32.mrf.mxu0 }
 0x37f   :  { %1406 = vpow2.f32 %v1268_v31  ;;  %v170_v31 = vadd.f32 %v1580_v6, %v169_v28 }
 0x38a   :  { %v1405_v30 = vpop.eup %1404 }
 0x38b   :  { %373 = vrot.lane.b32.xlu0 %v1405_v30, %s1484_s25 }
 0x38c   :  { %v1407_v32 = vpop.eup %1406 }
 0x38d   :  { %v367_v33 = vadd.f32 1.0, %v1407_v32 }
 0x38f   :  { %1408 = vrcp.f32 %v367_v33 }
 0x39c   :  { %v1409_v34 = vpop.eup %1408 }
 0x39d   :  { %v371_v37 = vmul.f32 %v1409_v34, %v281_v21  ;;  %v44_v21 = vld [vmem:[%s1716_s0 + $0x30] sm:$0xff] }
 0x39e   :  { %1330 = vmatprep.mubr.msk.f32.mxu0 %vm54_vm1, %v44_v21 }
 0x39f   :  { %1331 = vmatmul.mubr.msk.f32.gmra.mxu0 %vm54_vm1, %v45_v22 }
 0x3a0   :  { %1355 = vmatprep.mubr.msk.f32.mxu0 %vm1483_vm2, %v1482_v4 }
 0x3fd   :  { %v374_v35 = vpop.permute.xlu0 %373 }
 0x3fe   :  { %v376_v36 = vmul.f32 %v1409_v34, %v374_v35 }
 0x400   :  { %378 = vrot.lane.b32.xlu1 %v376_v36, %s1485_s3 }
 0x45f   :  { %v1648_v29 = vpop.f32.mrf.mxu0 }
 0x461   :  { %v179_v30 = vpop.f32.mrf.mxu0 }
 0x472   :  { %v379_v38 = vpop.permute.xlu1 %378 }
 0x473   :  { %v381_v39 = vadd.f32 %v379_v38, %v371_v37 }
 0x475   :  { %1410 = vtanh.f32 %v381_v39 }
 0x482   :  { %v1411_v42 = vpop.eup %1410 }
 0x483   :  { %384 = vrot.lane.b32.xlu0 %v1411_v42, %s1485_s3 }
 0x4f5   :  { %v385_v43 = vpop.permute.xlu0 %384 }
 0x4f6   :  { %v387_v44 = vmul.f32 %v1409_v34, %v385_v43 }
 0x4f8   :  { %389 = vrot.lane.b32.xlu1 %v387_v44, %s1486_s26 }
 0x56a   :  { %v390_v45 = vpop.permute.xlu1 %389 }
 0x56b   :  { %1346 = vmatmul.mubr.msk.f32.vlgmr.msra.gmra.mxu1 %vm189_vm3, %v390_v45 }
 0x56c   :  { %1349 = vmatpush3.msra.mxu1 %v1561_v3  ;;  %1350 = vmatprep.mubr.msk.f32.mxu1 %vm1483_vm2, %v1482_v4 }
 0x56d   :  { %1358 = vmatprep.subr.mxu1 %v1482_v4 }
 0x62b   :  { %v459_v49 = vpop.f32.mrf.mxu1 }
 0x62c   :  { %v463_v50 = vadd.f32 %v459_v49, %v160_v48  ;;  %v175_v49 = vadd.f32 %v1329_v27, %v1580_v6 }
 0x62d   :  { %v1347_v51 = vpop.f32.mrf.mxu1 }
 0x62e   :  { %1412 = vtanh.f32 %v463_v50  ;;  %v1270_v53 = vmul.f32 -1.442695, %v463_v50 }
 0x630   :  { %1414 = vpow2.f32 %v1270_v53 }
 0x63b   :  { %v1413_v52 = vpop.eup %1412 }
 0x63c   :  { %473 = vrot.lane.b32.xlu0 %v1413_v52, %s1484_s25 }
 0x63d   :  { %v1415_v54 = vpop.eup %1414 }
 0x63e   :  { %v467_v55 = vadd.f32 1.0, %v1415_v54 }
 0x640   :  { %1416 = vrcp.f32 %v467_v55 }
 0x64d   :  { %v1417_v56 = vpop.eup %1416 }
 0x64e   :  { %v471_v59 = vmul.f32 %v1417_v56, %v381_v39 }
 0x6ae   :  { %v474_v57 = vpop.permute.xlu0 %473 }
 0x6af   :  { %v476_v58 = vmul.f32 %v1417_v56, %v474_v57 }
 0x6b1   :  { %478 = vrot.lane.b32.xlu1 %v476_v58, %s1485_s3 }
 0x723   :  { %v479_v60 = vpop.permute.xlu1 %478 }
 0x724   :  { %v481_v61 = vadd.f32 %v479_v60, %v471_v59 }
 0x726   :  { %1418 = vtanh.f32 %v481_v61 }
 0x733   :  { %v1419_v62 = vpop.eup %1418 }
 0x734   :  { %484 = vrot.lane.b32.xlu0 %v1419_v62, %s1485_s3 }
 0x7a6   :  { %v485_v63 = vpop.permute.xlu0 %484 }
 0x7a7   :  { %v487_v0 = vmul.f32 %v1417_v56, %v485_v63 }
 0x7a9   :  { %489 = vrot.lane.b32.xlu1 %v487_v0, %s1486_s26 }
 0x81b   :  { %v490_v1 = vpop.permute.xlu1 %489 }
 0x81c   :  { %1351 = vmatmul.mubr.msk.f32.vlgmr.msra.gmra.mxu1 %vm189_vm3, %v490_v1 }
 0x81d   :  { %1359 = vmatpush3.msra.mxu1 %v1561_v3  ;;  %1360 = vmatprep.mubr.msk.f32.mxu1 %vm1483_vm2, %v1482_v4 }
 0x81e   :  { %1368 = vmatprep.subr.mxu1 %v1482_v4 }
 0x8dc   :  { %v559_v5 = vpop.f32.mrf.mxu1 }
 0x8dd   :  { %v563_v7 = vadd.f32 %v559_v5, %v165_v2  ;;  %v180_v2 = vadd.f32 %v1580_v6, %v179_v30 }
 0x8de   :  { %v1352_v8 = vpop.f32.mrf.mxu1 }
 0x8df   :  { %1420 = vtanh.f32 %v563_v7  ;;  %v1272_v10 = vmul.f32 -1.442695, %v563_v7 }
 0x8e1   :  { %1422 = vpow2.f32 %v1272_v10 }
 0x8ec   :  { %v1421_v9 = vpop.eup %1420 }
 0x8ed   :  { %573 = vrot.lane.b32.xlu0 %v1421_v9, %s1484_s25 }
 0x8ee   :  { %v1423_v11 = vpop.eup %1422 }
 0x8ef   :  { %v567_v12 = vadd.f32 1.0, %v1423_v11 }
 0x8f1   :  { %1424 = vrcp.f32 %v567_v12 }
 0x8fe   :  { %v1425_v13 = vpop.eup %1424 }
 0x8ff   :  { %v571_v16 = vmul.f32 %v1425_v13, %v481_v61 }
 0x95f   :  { %v574_v14 = vpop.permute.xlu0 %573 }
 0x960   :  { %v576_v15 = vmul.f32 %v1425_v13, %v574_v14 }
 0x962   :  { %578 = vrot.lane.b32.xlu1 %v576_v15, %s1485_s3 }
 0x9d4   :  { %v579_v17 = vpop.permute.xlu1 %578 }
 0x9d5   :  { %v581_v18 = vadd.f32 %v579_v17, %v571_v16 }
 0x9d7   :  { %1426 = vtanh.f32 %v581_v18 }
 0x9e4   :  { %v1427_v23 = vpop.eup %1426 }
 0x9e5   :  { %584 = vrot.lane.b32.xlu0 %v1427_v23, %s1485_s3  ;;  %v185_v23 = vadd.f32 %v1648_v29, %v1580_v6  ;;  %v988_v29 = vld [vmem:[%s1720_s4] sm:$0xff] }
 0xa57   :  { %v585_v24 = vpop.permute.xlu0 %584 }
 0xa58   :  { %v587_v25 = vmul.f32 %v1425_v13, %v585_v24 }
 0xa5a   :  { %589 = vrot.lane.b32.xlu1 %v587_v25, %s1486_s26 }
 0xacc   :  { %v590_v26 = vpop.permute.xlu1 %589 }
 0xacd   :  { %1356 = vmatmul.mubr.msk.f32.vlgmr.msra.gmra.mxu0 %vm189_vm3, %v590_v26 }
 0xace   :  { %1364 = vmatpush3.msra.mxu0 %v1561_v3  ;;  %1365 = vmatprep.mubr.msk.f32.mxu0 %vm1483_vm2, %v1482_v4 }
 0xacf   :  { %1373 = vmatprep.subr.mxu0 %v1482_v4 }
 0xb8d   :  { %v659_v32 = vpop.f32.mrf.mxu0 }
 0xb8e   :  { %v663_v33 = vadd.f32 %v659_v32, %v170_v31 }
 0xb8f   :  { %v1357_v34 = vpop.f32.mrf.mxu0 }
 0xb90   :  { %1428 = vtanh.f32 %v663_v33  ;;  %v1274_v36 = vmul.f32 -1.442695, %v663_v33 }
 0xb92   :  { %1430 = vpow2.f32 %v1274_v36 }
 0xb9d   :  { %v1429_v35 = vpop.eup %1428 }
 0xb9e   :  { %673 = vrot.lane.b32.xlu0 %v1429_v35, %s1484_s25 }
 0xb9f   :  { %v1431_v37 = vpop.eup %1430 }
 0xba0   :  { %v667_v38 = vadd.f32 1.0, %v1431_v37 }
 0xba2   :  { %1432 = vrcp.f32 %v667_v38  ;;  %v1074_v38 = vld [vmem:[%s1722_s6 + $0x8] sm:$0xff] }
 0xbaf   :  { %v1433_v39 = vpop.eup %1432 }
 0xbb0   :  { %v671_v42 = vmul.f32 %v1433_v39, %v581_v18 }
 0xc10   :  { %v674_v40 = vpop.permute.xlu0 %673 }
 0xc11   :  { %v676_v41 = vmul.f32 %v1433_v39, %v674_v40 }
 0xc13   :  { %678 = vrot.lane.b32.xlu1 %v676_v41, %s1485_s3 }
 0xc85   :  { %v679_v43 = vpop.permute.xlu1 %678 }
 0xc86   :  { %v681_v44 = vadd.f32 %v679_v43, %v671_v42  ;;  %v1073_v42 = vld [vmem:[%s1722_s6] sm:$0xff] }
 0xc87   :  { %v1281_v43 = vld [vmem:[%s1721_s5] ss:$0 sm:$0xff]  ;;  %s1487_s5 = smov [#allocation2]  }
 0xc88   :  { %1434 = vtanh.f32 %v681_v44  ;;  %s1244_s6 = sshll.u32 %s1487_s5, 4  ;;  %s1245_s6 = int_to_ptr.vmem [resolvable:$true] %s1244_s6 }
 0xc89   :  { %s1460_s27 = scalar_lea.vmem %s1245_s6, 128  ;;  %p1465_p1 = scmp.lt.s32.totalorder %s1245_s6, %s1245_s6 }
 0xc8a   :  { %p1461_p0 = scmp.ne.s32.totalorder %s1245_s6, %s1460_s27  ;;  %p1466_p2 = scmp.lt.s32.totalorder %s1460_s27, %s1460_s27 }
 0xc8c   :  { %p1467_p3 = por %p1466_p2, %p1465_p1 }
 0xc8e   :  { %p1468_p4 = pnand %p1467_p3, %p1461_p0 }
 0xc95   :  { %v1435_v45 = vpop.eup %1434 }
 0xc96   :  { %684 = vrot.lane.b32.xlu0 %v1435_v45, %s1485_s3 }
 0xd08   :  { %v685_v46 = vpop.permute.xlu0 %684 }
 0xd09   :  { %v687_v47 = vmul.f32 %v1433_v39, %v685_v46 }
 0xd0b   :  { %689 = vrot.lane.b32.xlu1 %v687_v47, %s1486_s26  ;;  %v1156_v47 = vld [vmem:[%s1724_s8] sm:$0xff] }
 0xd7d   :  { %v690_v48 = vpop.permute.xlu1 %689 }
 0xd7e   :  { %1361 = vmatmul.mubr.msk.f32.vlgmr.msra.gmra.mxu1 %vm189_vm3, %v690_v48 }
 0xd7f   :  { %1369 = vmatpush3.msra.mxu1 %v1561_v3  ;;  %1370 = vmatprep.mubr.msk.f32.mxu1 %vm1483_vm2, %v1482_v4 }
 0xd80   :  { %1378 = vmatprep.subr.mxu1 %v1482_v4 }
 0xe3e   :  { %v759_v50 = vpop.f32.mrf.mxu1 }
 0xe3f   :  { %v763_v51 = vadd.f32 %v759_v50, %v175_v49 }
 0xe40   :  { %v1362_v52 = vpop.f32.mrf.mxu1 }
 0xe41   :  { %1436 = vtanh.f32 %v763_v51  ;;  %v1276_v54 = vmul.f32 -1.442695, %v763_v51 }
 0xe43   :  { %1438 = vpow2.f32 %v1276_v54 }
 0xe4e   :  { %v1437_v53 = vpop.eup %1436 }
 0xe4f   :  { %773 = vrot.lane.b32.xlu0 %v1437_v53, %s1484_s25 }
 0xe50   :  { %v1439_v55 = vpop.eup %1438 }
 0xe51   :  { %v767_v56 = vadd.f32 1.0, %v1439_v55 }
 0xe53   :  { %1440 = vrcp.f32 %v767_v56 }
 0xe60   :  { %v1441_v3 = vpop.eup %1440 }
 0xe61   :  { %v771_v59 = vmul.f32 %v1441_v3, %v681_v44 }
 0xec1   :  { %v774_v57 = vpop.permute.xlu0 %773 }
 0xec2   :  { %v776_v58 = vmul.f32 %v1441_v3, %v774_v57 }
 0xec4   :  { %778 = vrot.lane.b32.xlu1 %v776_v58, %s1485_s3 }
 0xf36   :  { %v779_v60 = vpop.permute.xlu1 %778 }
 0xf37   :  { %v781_v61 = vadd.f32 %v779_v60, %v771_v59 }
 0xf39   :  { %1442 = vtanh.f32 %v781_v61 }
 0xf46   :  { %v1443_v62 = vpop.eup %1442 }
 0xf47   :  { %784 = vrot.lane.b32.xlu0 %v1443_v62, %s1485_s3 }
 0xfb9   :  { %v785_v63 = vpop.permute.xlu0 %784 }
 0xfba   :  { %v787_v0 = vmul.f32 %v1441_v3, %v785_v63 }
 0xfbc   :  { %789 = vrot.lane.b32.xlu1 %v787_v0, %s1486_s26 }
0x102e   :  { %v790_v1 = vpop.permute.xlu1 %789 }
0x102f   :  { %1366 = vmatmul.mubr.msk.f32.vlgmr.msra.gmra.mxu0 %vm189_vm3, %v790_v1 }
0x1030   :  { %1375 = vmatprep.mubr.msk.f32.mxu0 %vm1483_vm2, %v1482_v4  ;;  %1374 = vmatpush3.msra.mxu0 %v988_v29 }
0x1031   :  { %1385 = vmatprep.subr.mxu0 %v1482_v4 }
0x10ef   :  { %v859_v5 = vpop.f32.mrf.mxu0 }
0x10f0   :  { %v863_v7 = vadd.f32 %v859_v5, %v180_v2 }
0x10f1   :  { %v1367_v8 = vpop.f32.mrf.mxu0 }
0x10f2   :  { %1444 = vtanh.f32 %v863_v7  ;;  %v1278_v10 = vmul.f32 -1.442695, %v863_v7 }
0x10f4   :  { %1446 = vpow2.f32 %v1278_v10 }
0x10ff   :  { %v1445_v9 = vpop.eup %1444 }
0x1100   :  { %873 = vrot.lane.b32.xlu0 %v1445_v9, %s1484_s25 }
0x1101   :  { %v1447_v11 = vpop.eup %1446 }
0x1102   :  { %v867_v12 = vadd.f32 1.0, %v1447_v11 }
0x1104   :  { %1448 = vrcp.f32 %v867_v12 }
0x1111   :  { %v1449_v13 = vpop.eup %1448 }
0x1112   :  { %v871_v16 = vmul.f32 %v1449_v13, %v781_v61 }
0x1172   :  { %v874_v14 = vpop.permute.xlu0 %873 }
0x1173   :  { %v876_v15 = vmul.f32 %v1449_v13, %v874_v14 }
0x1175   :  { %878 = vrot.lane.b32.xlu1 %v876_v15, %s1485_s3 }
0x11e7   :  { %v879_v17 = vpop.permute.xlu1 %878 }
0x11e8   :  { %v881_v18 = vadd.f32 %v879_v17, %v871_v16 }
0x11ea   :  { %1450 = vtanh.f32 %v881_v18 }
0x11f7   :  { %v1451_v19 = vpop.eup %1450 }
0x11f8   :  { %884 = vrot.lane.b32.xlu0 %v1451_v19, %s1485_s3 }
0x126a   :  { %v885_v20 = vpop.permute.xlu0 %884 }
0x126b   :  { %v887_v21 = vmul.f32 %v1449_v13, %v885_v20 }
0x126d   :  { %889 = vrot.lane.b32.xlu1 %v887_v21, %s1486_s26 }
0x12df   :  { %v890_v22 = vpop.permute.xlu1 %889 }
0x12e0   :  { %1371 = vmatmul.mubr.msk.f32.vlgmr.msra.gmra.mxu1 %vm189_vm3, %v890_v22 }
0x12e1   :  { %1382 = vmatprep.mubr.msk.f32.mxu1 %vm1483_vm2, %v1482_v4  ;;  %1379 = vmatpush3.msra.mxu1 %v1074_v38 }
0x12e2   :  { %1380 = vmatprep.subr.mxu1 %v1482_v4 }
0x12e3   :  { %1381 = vmatpush3.msra.mxu1 %v1073_v42 }
0x13a0   :  { %v959_v24 = vpop.f32.mrf.mxu1 }
0x13a1   :  { %v963_v25 = vadd.f32 %v959_v24, %v185_v23 }
0x13a2   :  { %v1372_v26 = vpop.f32.mrf.mxu1 }
0x13a3   :  { %1452 = vtanh.f32 %v963_v25  ;;  %v1280_v28 = vmul.f32 -1.442695, %v963_v25 }
0x13a5   :  { %1454 = vpow2.f32 %v1280_v28 }
0x13b0   :  { %v1453_v27 = vpop.eup %1452 }
0x13b1   :  { %973 = vrot.lane.b32.xlu0 %v1453_v27, %s1484_s25 }
0x13b2   :  { %v1455_v30 = vpop.eup %1454 }
0x13b3   :  { %v967_v31 = vadd.f32 1.0, %v1455_v30 }
0x13b5   :  { %1456 = vrcp.f32 %v967_v31 }
0x13c2   :  { %v1457_v32 = vpop.eup %1456 }
0x13c3   :  { %v971_v35 = vmul.f32 %v1457_v32, %v881_v18 }
0x1423   :  { %v974_v33 = vpop.permute.xlu0 %973 }
0x1424   :  { %v976_v34 = vmul.f32 %v1457_v32, %v974_v33 }
0x1426   :  { %978 = vrot.lane.b32.xlu1 %v976_v34, %s1485_s3 }
0x1498   :  { %v979_v36 = vpop.permute.xlu1 %978 }
0x1499   :  { %v981_v6 = vadd.f32 %v979_v36, %v971_v35 }
0x149b   :  { %1458 = vtanh.f32 %v981_v6 }
0x14a8   :  { %v1459_v37 = vpop.eup %1458 }
0x14a9   :  { %984 = vrot.lane.b32.xlu0 %v1459_v37, %s1485_s3 }
0x151b   :  { %v985_v39 = vpop.permute.xlu0 %984 }
0x151c   :  { %v987_v40 = vmul.f32 %v1457_v32, %v985_v39 }
0x151e   :  { %997 = vrot.lane.b32.xlu1 %v987_v40, %s1486_s26 }
0x1590   :  { %v998_v41 = vpop.permute.xlu1 %997 }
0x1591   :  { %1376 = vmatmul.mubr.msk.f32.vlgmr.msra.gmra.mxu0 %vm189_vm3, %v998_v41 }
0x1592   :  { %1387 = vmatprep.mubr.msk.f32.mxu0 %vm1483_vm2, %v1482_v4  ;;  %1386 = vmatpush3.msra.mxu0 %v1156_v47  ;;  %v1283_v4 = vld [vmem:[%s1723_s7] ss:$0 sm:$0xff] }
0x1651   :  { %v1067_v44 = vpop.f32.mrf.mxu0 }
0x1652   :  { %v1068_v45 = vadd.f32 %v1281_v43, %v1067_v44 }
0x1653   :  { %v1377_v46 = vpop.f32.mrf.mxu0 }
0x1654   :  { %1383 = vmatmul.mubr.msk.f32.vlgmr.msra.gmra.mxu1 %vm1071_vm4, %v1068_v45  ;;  %1072 = vst.msk [vmem:[#allocation2] sm:$0xff] %vm1071_vm4, %v1068_v45 }
0x1714   :  { %v1151_v48 = vpop.f32.mrf.mxu1 }
0x1715   :  { %v1152_v49 = vadd.f32 %v1283_v4, %v1151_v48 }
0x1716   :  { %v1384_v50 = vpop.f32.mrf.mxu1 }
0x1717   :  { %v1155_v51 = vmax.f32 %v1152_v49, 0.0 }
0x1719   :  { %1388 = vmatmul.mubr.msk.f32.vlgmr.msra.gmra.mxu0 %vm189_vm3, %v1155_v51 }
0x171a   :  { %1471 = shalt.err (!%p1468_p4)
}
0x171b   :  { %1247 = dma.vmem_to_hbm [thread:$0]  %s1245_s6, 128, %s1726_s10, [#allocation3]   ;;  %v1285_v52 = vld [vmem:[%s1725_s9] ss:$0 sm:$0xff] }
0x17d9   :  { %v1233_v53 = vpop.f32.mrf.mxu0 }
0x17da   :  { %v1234_v54 = vadd.f32 %v1285_v52, %v1233_v53 }
0x17db   :  { %v1389_v55 = vpop.f32.mrf.mxu0 }
0x17dc   :  { %1237 = vst.msk [vmem:[%s1727_s11] sm:$0xff] %vm54_vm1, %v1234_v54 }
0x17dd   :  { %1480 = dma.done.wait [#allocation3], 128  }
0x17de   :  { %1481 = vsyncadd [#allocation3], 4294967168 }
0x17df   :  { %1255 = vsyncpa [#allocation3], 1 }

</bundles_post_ra>
